<compile_context>
chip_gen: v7x
topology: tpu7x:2x2x1
jax: 0.10.0
libtpu: 0.0.40
codegen_flags: <defaults>
</compile_context>

<pallas_src>
import functools

import jax
import jax.numpy as jnp
from jax.experimental import pallas as pl
from jax.experimental.pallas import tpu as pltpu

LANE = 128      # vreg lane width (last dim)
SUBLANE = 8     # vreg sublane count (second-to-last dim, f32)


def _round_up(x, m):
    return ((x + m - 1) // m) * m


def mlp_kernel(x_ref, w1_ref, b1_ref, w2_ref, b2_ref, o_ref, h_ref):
    # hidden = relu(x @ W1 + b1), staged through VMEM scratch so the
    # intermediate's live range is bounded between the two MXU passes.
    h_ref[...] = jnp.maximum(
        jnp.dot(x_ref[...], w1_ref[...],
                preferred_element_type=jnp.float32,
                precision=jax.lax.Precision.HIGHEST)
        + b1_ref[...],
        0.0,
    )
    # out = hidden @ W2 + b2  (f32 accumulation; cast only at the store)
    o_ref[...] = (
        jnp.dot(h_ref[...], w2_ref[...],
                preferred_element_type=jnp.float32,
                precision=jax.lax.Precision.HIGHEST)
        + b2_ref[...]
    ).astype(o_ref.dtype)


def pad_params(w1, b1, w2, b2):
    """One-time (init-time) padding of the hidden dim to a 128-lane multiple.

    w1: (n_feature, n_hidden), b1: (n_hidden,)  (W already transposed)
    w2: (n_hidden, n_output),  b2: (n_output,)
    The padded hidden columns/rows are zero, so the math is exact; the feature
    and output dims are deliberately left at their natural (tiny) widths.
    """
    n_hidden = w1.shape[1]
    h_pad = _round_up(max(n_hidden, LANE), LANE)
    w1_p = jnp.pad(w1, ((0, 0), (0, h_pad - n_hidden)))
    b1_p = jnp.pad(b1, (0, h_pad - n_hidden)).reshape(1, h_pad)
    w2_p = jnp.pad(w2, ((0, h_pad - n_hidden), (0, 0)))
    b2_p = b2.reshape(1, -1)
    return w1_p, b1_p, w2_p, b2_p


@functools.partial(jax.jit, static_argnames=("tile_n",))
def net_forward(x, w1_p, b1_p, w2_p, b2_p, *, tile_n=512):
    """x: (N, n_feature) f32; padded params from `pad_params`.
    Returns (N, n_output) f32."""
    n, n_feat = x.shape
    h_pad = w1_p.shape[1]
    n_out = w2_p.shape[1]

    # --- batch tiling (sublane aligned) -------------------------------------
    n_sub = _round_up(n, SUBLANE)
    tn = _round_up(min(tile_n, n_sub), SUBLANE)
    # Guarantee >= 2 grid steps when the batch allows it so v7x's two
    # TensorCores both get work ("parallel" axis has something to shard).
    if n_sub // tn < 2 and n_sub >= 2 * SUBLANE:
        tn = _round_up(pl.cdiv(n_sub, 2), SUBLANE)
    n_pad = _round_up(n_sub, tn)
    grid_n = n_pad // tn

    # Only per-call padding is batch rows (zero rows are sliced away below).
    x_p = jnp.pad(x, ((0, n_pad - n), (0, 0))) if n_pad != n else x

    flops = 2 * n_pad * (n_feat * h_pad + h_pad * n_out)
    bytes_accessed = 4 * (
        n_pad * n_feat + n_feat * h_pad + h_pad + h_pad * n_out + n_out
        + n_pad * n_out
    )

    # Explicit VMEM budget: double-buffered x/out tiles + resident weights and
    # biases + hidden scratch, with 4x headroom (floored at 32 MiB).
    work_set_bytes = 4 * (
        2 * tn * n_feat + 2 * tn * n_out
        + n_feat * h_pad + h_pad + h_pad * n_out + n_out
        + tn * h_pad
    )
    vmem_limit = int(min(128 * 1024 * 1024,
                         max(32 * 1024 * 1024, 4 * work_set_bytes)))

    out = pl.pallas_call(
        mlp_kernel,
        out_shape=jax.ShapeDtypeStruct((n_pad, n_out), jnp.float32),
        grid=(grid_n,),
        in_specs=[
            # x: batch-tiled, feature dim at full (natural) extent -> no lane
            # padding, minimal HBM read traffic.
            pl.BlockSpec((tn, n_feat), lambda i: (i, 0)),
            pl.BlockSpec((n_feat, h_pad), lambda i: (0, 0)),   # W1: resident
            pl.BlockSpec((1, h_pad), lambda i: (0, 0)),        # b1: resident
            pl.BlockSpec((h_pad, n_out), lambda i: (0, 0)),    # W2: resident
            pl.BlockSpec((1, n_out), lambda i: (0, 0)),        # b2: resident
        ],
        # out: batch-tiled, output dim at full extent (masked vst beats 64x
        # HBM write amplification + an extra slice pass for tiny n_out).
        out_specs=pl.BlockSpec((tn, n_out), lambda i: (i, 0)),
        scratch_shapes=[pltpu.VMEM((tn, h_pad), jnp.float32)],  # hidden stage
        compiler_params=pltpu.CompilerParams(
            dimension_semantics=("parallel",),   # batch shards across 2 TCs on v7x
            vmem_limit_bytes=vmem_limit,
        ),
        cost_estimate=pl.CostEstimate(
            flops=flops, transcendentals=0, bytes_accessed=bytes_accessed
        ),
    )(x_p, w1_p, b1_p, w2_p, b2_p)

    return out[:n] if n_pad != n else out


def init_linear(key, fan_in, fan_out):
    """Deterministic PyTorch-style Linear init: U(-1/sqrt(fan_in), 1/sqrt(fan_in)).
    Returns (W, b) with W already transposed to (fan_in, fan_out)."""
    kw, kb = jax.random.split(key)
    bound = 1.0 / jnp.sqrt(jnp.float32(fan_in))
    w = jax.random.uniform(kw, (fan_in, fan_out), jnp.float32, -bound, bound)
    b = jax.random.uniform(kb, (fan_out,), jnp.float32, -bound, bound)
    return w, b


if __name__ == "__main__":
    # Shapes implied by the module / driver script: n_feature=2, n_output=2.
    N, N_FEATURE, N_HIDDEN, N_OUTPUT = 16, 2, 32, 2

    key = jax.random.PRNGKey(0)
    kx, k1, k2 = jax.random.split(key, 3)

    # Input mimicking torch.cat of two gaussian clusters (deterministic here).
    half = N // 2
    x0 = 2.0 + jax.random.normal(kx, (half, N_FEATURE), jnp.float32)
    x1 = -2.0 + jax.random.normal(jax.random.fold_in(kx, 1),
                                  (half, N_FEATURE), jnp.float32)
    x = jnp.concatenate([x0, x1], axis=0)

    w1, b1 = init_linear(k1, N_FEATURE, N_HIDDEN)
    w2, b2 = init_linear(k2, N_HIDDEN, N_OUTPUT)

    # One-time parameter padding, hoisted out of the per-call path.
    w1_p, b1_p, w2_p, b2_p = pad_params(w1, b1, w2, b2)

    out = net_forward(x, w1_p, b1_p, w2_p, b2_p)
    jax.block_until_ready(out)

    # Cross-check against plain-JAX reference at the same (explicit) precision.
    hi = jax.lax.Precision.HIGHEST
    ref = jnp.dot(jnp.maximum(jnp.dot(x, w1, precision=hi) + b1, 0.0),
                  w2, precision=hi) + b2
    assert out.shape == (N, N_OUTPUT), out.shape
    assert jnp.allclose(out, ref, atol=2e-5, rtol=2e-5), \
        float(jnp.abs(out - ref).max())

    print("KERNEL_OK")
</pallas_src>

<mosaic_0001>
module attributes {stable_mosaic.version = 11 : i64} {
  func.func @mlp_kernel(%arg0: i32, %arg1: memref<8x2xf32, #tpu.memory_space<vmem>>, %arg2: memref<2x128xf32, #tpu.memory_space<vmem>>, %arg3: memref<1x128xf32, #tpu.memory_space<vmem>>, %arg4: memref<128x2xf32, #tpu.memory_space<vmem>>, %arg5: memref<1x2xf32, #tpu.memory_space<vmem>>, %arg6: memref<8x2xf32, #tpu.memory_space<vmem>>, %arg7: memref<8x128xf32, #tpu.memory_space<vmem>>) attributes {dimension_semantics = [#tpu.dimension_semantics<parallel>], iteration_bounds = array<i64: 2>, scalar_prefetch = 0 : i64, scratch_operands = 1 : i64, tpu.core_type = #tpu.core_type<tc>, window_params = [{transform_indices = @transform_0, window_bounds = array<i64: 8, 2>}, {pipeline_mode = #tpu.pipeline_mode<synchronous>, transform_indices = @transform_1, window_bounds = array<i64: 2, 128>}, {pipeline_mode = #tpu.pipeline_mode<synchronous>, transform_indices = @transform_2, window_bounds = array<i64: 1, 128>}, {pipeline_mode = #tpu.pipeline_mode<synchronous>, transform_indices = @transform_3, window_bounds = array<i64: 128, 2>}, {pipeline_mode = #tpu.pipeline_mode<synchronous>, transform_indices = @transform_4, window_bounds = array<i64: 1, 2>}, {transform_indices = @transform_5, window_bounds = array<i64: 8, 2>}]} {
    %c0 = arith.constant 0 : index
    %c0_0 = arith.constant 0 : index
    %0 = vector.load %arg1[%c0, %c0_0] : memref<8x2xf32, #tpu.memory_space<vmem>>, vector<8x2xf32>
    %c0_1 = arith.constant 0 : index
    %c0_2 = arith.constant 0 : index
    %1 = vector.load %arg2[%c0_1, %c0_2] : memref<2x128xf32, #tpu.memory_space<vmem>>, vector<2x128xf32>
    %cst = arith.constant dense<0.000000e+00> : vector<8x128xf32>
    %2 = tpu.matmul %0, %1, %cst {dimension_numbers = #tpu.dot_dimension_numbers<[1], [0], [0], [1], [0, 0, 1, 1], [], []>, precision = #tpu.contract_precision<fp32>} : vector<8x2xf32>, vector<2x128xf32>, vector<8x128xf32> -> vector<8x128xf32>
    %c0_3 = arith.constant 0 : index
    %c0_4 = arith.constant 0 : index
    %3 = vector.load %arg3[%c0_3, %c0_4] : memref<1x128xf32, #tpu.memory_space<vmem>>, vector<1x128xf32>
    %4 = vector.broadcast %3 : vector<1x128xf32> to vector<8x128xf32>
    %5 = arith.addf %2, %4 : vector<8x128xf32>
    %cst_5 = arith.constant 0.000000e+00 : f32
    %6 = vector.broadcast %cst_5 : f32 to vector<8x128xf32>
    %7 = arith.maximumf %5, %6 : vector<8x128xf32>
    %c0_6 = arith.constant 0 : index
    %c0_7 = arith.constant 0 : index
    %8 = vector.load %arg7[%c0_6, %c0_7] : memref<8x128xf32, #tpu.memory_space<vmem>>, vector<8x128xf32>
    tpu.vector_store %arg7[%c0_6, %c0_7], %7 {strides = array<i32>} : memref<8x128xf32, #tpu.memory_space<vmem>>, vector<8x128xf32>,
    %c0_8 = arith.constant 0 : index
    %c0_9 = arith.constant 0 : index
    %9 = vector.load %arg7[%c0_8, %c0_9] : memref<8x128xf32, #tpu.memory_space<vmem>>, vector<8x128xf32>
    %c0_10 = arith.constant 0 : index
    %c0_11 = arith.constant 0 : index
    %10 = vector.load %arg4[%c0_10, %c0_11] : memref<128x2xf32, #tpu.memory_space<vmem>>, vector<128x2xf32>
    %cst_12 = arith.constant dense<0.000000e+00> : vector<8x2xf32>
    %11 = tpu.matmul %9, %10, %cst_12 {dimension_numbers = #tpu.dot_dimension_numbers<[1], [0], [0], [1], [0, 0, 1, 1], [], []>, precision = #tpu.contract_precision<fp32>} : vector<8x128xf32>, vector<128x2xf32>, vector<8x2xf32> -> vector<8x2xf32>
    %c0_13 = arith.constant 0 : index
    %c0_14 = arith.constant 0 : index
    %12 = vector.load %arg5[%c0_13, %c0_14] : memref<1x2xf32, #tpu.memory_space<vmem>>, vector<1x2xf32>
    %13 = vector.broadcast %12 : vector<1x2xf32> to vector<8x2xf32>
    %14 = arith.addf %11, %13 : vector<8x2xf32>
    %c0_15 = arith.constant 0 : index
    %c0_16 = arith.constant 0 : index
    %15 = vector.load %arg6[%c0_15, %c0_16] : memref<8x2xf32, #tpu.memory_space<vmem>>, vector<8x2xf32>
    tpu.vector_store %arg6[%c0_15, %c0_16], %14 {strides = array<i32>} : memref<8x2xf32, #tpu.memory_space<vmem>>, vector<8x2xf32>,
    return
  }
  func.func @transform_0(%arg0: i32) -> (i32, i32) {
    %c0_i32 = arith.constant 0 : i32
    %c0_i32_0 = arith.constant 0 : i32
    return %arg0, %c0_i32 : i32, i32
  }
  func.func @transform_1(%arg0: i32) -> (i32, i32) {
    %c0_i32 = arith.constant 0 : i32
    %c0_i32_0 = arith.constant 0 : i32
    %c0_i32_1 = arith.constant 0 : i32
    return %c0_i32, %c0_i32_0 : i32, i32
  }
  func.func @transform_2(%arg0: i32) -> (i32, i32) {
    %c0_i32 = arith.constant 0 : i32
    %c0_i32_0 = arith.constant 0 : i32
    %c0_i32_1 = arith.constant 0 : i32
    return %c0_i32, %c0_i32_0 : i32, i32
  }
  func.func @transform_3(%arg0: i32) -> (i32, i32) {
    %c0_i32 = arith.constant 0 : i32
    %c0_i32_0 = arith.constant 0 : i32
    %c0_i32_1 = arith.constant 0 : i32
    return %c0_i32, %c0_i32_0 : i32, i32
  }
  func.func @transform_4(%arg0: i32) -> (i32, i32) {
    %c0_i32 = arith.constant 0 : i32
    %c0_i32_0 = arith.constant 0 : i32
    %c0_i32_1 = arith.constant 0 : i32
    return %c0_i32, %c0_i32_0 : i32, i32
  }
  func.func @transform_5(%arg0: i32) -> (i32, i32) {
    %c0_i32 = arith.constant 0 : i32
    %c0_i32_0 = arith.constant 0 : i32
    return %arg0, %c0_i32 : i32, i32
  }
}

</mosaic_0001>

<bundles_post_ra>
// kernel: net_forward.1
= control target key start
LH: loop header
LB: loop body
LE: loop exit
PB: predicated region body
PF: predicated region fallthrough
CT: control target
= control target key end

     0   :  { %s1985_s18 = smov 0   ;;  %s2351_s0 = inlined_call_operand.vmem [shape: f32[16,2], index: 0, kind: input, shape index: {}]   ;;  %s2352_s1 = inlined_call_operand.vmem [shape: f32[2,128], index: 1, kind: input, shape index: {}]   ;;  %s2353_s2 = inlined_call_operand.vmem [shape: f32[1,128], index: 2, kind: input, shape index: {}]   ;;  %s2354_s3 = inlined_call_operand.vmem [shape: f32[128,2], index: 3, kind: input, shape index: {}]   ;;  %s2355_s4 = inlined_call_operand.vmem [shape: f32[1,2], index: 4, kind: input, shape index: {}]   ;;  %s2356_s5 = inlined_call_operand.vmem [shape: f32[16,2], index: 5, kind: output, shape index: {}]  }
   0x1 LB: > { %s1404_s19 = sadd.s32 4294967295, %s1950_s18   ;;  %p1408_p0 = scmp.ge.s32.totalorder %s1950_s18, 1  ;;  %s1950_s18 = sphi %s1985_s18, %s15_s18  }
   0x2   : > { %p186_p1 = scmp.lt.s32.totalorder %s1950_s18, 3 }
   0x4   : > { %p187_p2 = pnand %p1408_p0, %p186_p1 }
   0x5   : > { %v221_v0 = vld [vmem:[%s2352_s1] sm:$0x3] (!%p187_p2)  ;;  %vm233_vm0 = vcmask (!%p187_p2), 1041408   ;;  %p212_p3 = scmp.lt.s32.totalorder (!%p187_p2), %s1404_s19, 1  ;;  %v1952_v1 = vmov (!%p187_p2), 0.0   ;;  %vm1953_vm1 = vmmov (!%p187_p2), 0  }
   0x6   : > { %190 = sbr.rel (%p187_p2) target bundleno = 553 (0x229), region = 40  ;;  %1544 = vmatprep.subr.mxu0 (!%p187_p2), %v1952_v1  ;;  %v235_v2 = vsel (!%p187_p2), %vm233_vm0, %v221_v0, 0  ;;  %1546 = vmatprep.mubr.msk.f32.mxu0 (!%p187_p2), %vm1953_vm1, %v1952_v1  ;;  %v2002_v3 = vld [vmem:[%s2354_s3] sm:$0xff] (!%p187_p2)  ;;  %v2007_v4 = vld [vmem:[%s2354_s3 + $0x8] sm:$0xff] (!%p187_p2)  ;;  %v2012_v5 = vld [vmem:[%s2354_s3 + $0x10] sm:$0xff] (!%p187_p2)  ;;  %vm229_vm2 = vcmask (!%p187_p2), 15360  }
   0x7   : > { %v238_v6 = vand.u32 (!%p187_p2), 4294901760, %v235_v2  ;;  %1529 = vmatprep.subr.mxu1 (!%p187_p2), %v1952_v1  ;;  %1531 = vmatprep.mubr.msk.f32.mxu1 (!%p187_p2), %vm1953_vm1, %v1952_v1  ;;  %v710_v7 = vand.u32 (!%p187_p2), 4294901760, %v2002_v3  ;;  %v689_v8 = vld [vmem:[%s2354_s3 + $0x18] sm:$0xff] (!%p187_p2)  ;;  %v713_v9 = vand.u32 (!%p187_p2), 4294901760, %v2007_v4  ;;  %v716_v10 = vand.u32 (!%p187_p2), 4294901760, %v2012_v5  ;;  %v2028_v11 = vld [vmem:[%s2354_s3 + $0x20] sm:$0xff] (!%p187_p2) }
   0x8   : > { %v691_v12 = vld [vmem:[%s2354_s3 + $0x28] sm:$0xff] (!%p187_p2)  ;;  %v2036_v13 = vld [vmem:[%s2354_s3 + $0x30] sm:$0xff] (!%p187_p2)  ;;  %v719_v16 = vand.u32 (!%p187_p2), 4294901760, %v689_v8  ;;  %v722_v17 = vand.u32 (!%p187_p2), 4294901760, %v2028_v11  ;;  %v693_v18 = vld [vmem:[%s2354_s3 + $0x38] sm:$0xff] (!%p187_p2)  ;;  %v1954_v39 = vmov (!%p187_p2), 0.0|0.0  }
   0x9   : > { %v315_v14 = vsub.f32 (!%p187_p2), %v235_v2, %v238_v6  ;;  %1545 = vmatpush3.msra.mxu0 (!%p187_p2), %v238_v6  ;;  %1530 = vmatpush3.msra.mxu1 (!%p187_p2), %v238_v6  ;;  %v2040_v15 = vsub.f32 (!%p187_p2), %v2002_v3, %v710_v7  ;;  %v2054_v19 = vsub.f32 (!%p187_p2), %v2007_v4, %v713_v9  ;;  %v725_v21 = vand.u32 (!%p187_p2), 4294901760, %v691_v12  ;;  %v694_v44 = vld [vmem:[%s2354_s3 + $0x40] sm:$0xff] (!%p187_p2)  ;;  %v695_v45 = vld [vmem:[%s2354_s3 + $0x48] sm:$0xff] (!%p187_p2)  ;;  %v696_v49 = vld [vmem:[%s2354_s3 + $0x50] sm:$0xff] (!%p187_p2) }
   0xa   : > { %1534 = vmatprep.subr.mxu1 (!%p187_p2), %v1952_v1  ;;  %1549 = vmatprep.subr.mxu0 (!%p187_p2), %v1952_v1  ;;  %v2057_v20 = vsub.f32 (!%p187_p2), %v2012_v5, %v716_v10  ;;  %v2059_v23 = vsub.f32 (!%p187_p2), %v689_v8, %v719_v16  ;;  %v2062_v24 = vsub.f32 (!%p187_p2), %v2028_v11, %v722_v17  ;;  %v728_v25 = vand.u32 (!%p187_p2), 4294901760, %v2036_v13  ;;  %v697_v50 = vld [vmem:[%s2354_s3 + $0x58] sm:$0xff] (!%p187_p2)  ;;  %v698_v56 = vld [vmem:[%s2354_s3 + $0x60] sm:$0xff] (!%p187_p2)  ;;  %v699_v57 = vld [vmem:[%s2354_s3 + $0x68] sm:$0xff] (!%p187_p2) }
   0xb   : > { %v316_v27 = vand.u32 (!%p187_p2), 4294901760, %v315_v14  ;;  %v2066_v28 = vsub.f32 (!%p187_p2), %v691_v12, %v725_v21  ;;  %v731_v29 = vand.u32 (!%p187_p2), 4294901760, %v693_v18  ;;  %v2085_v40 = vpack.c.bf16 (!%p187_p2), %v713_v9, %v710_v7  ;;  %v700_v61 = vld [vmem:[%s2354_s3 + $0x70] sm:$0xff] (!%p187_p2)  ;;  %v701_v62 = vld [vmem:[%s2354_s3 + $0x78] sm:$0xff] (!%p187_p2) }
   0xc   : > { %v2069_v31 = vsub.f32 (!%p187_p2), %v2036_v13, %v728_v25  ;;  %v2091_v41 = vpack.c.bf16 (!%p187_p2), %v719_v16, %v716_v10  ;;  %v2097_v42 = vpack.c.bf16 (!%p187_p2), %v725_v21, %v722_v17  ;;  %v734_v46 = vand.u32 (!%p187_p2), 4294901760, %v694_v44 }
   0xd   : > { %s2358_s19 = smov (!%p212_p3, %s1404_s19), 1  ;;  %v2071_v32 = vsub.f32 %v693_v18, %v731_v29  ;;  %v317_v34 = vsub.f32 %v315_v14, %v316_v27  ;;  %v2105_v43 = vpack.c.bf16 %v731_v29, %v728_v25  ;;  %v737_v47 = vand.u32 4294901760, %v695_v45 }
   0xe   : > { %s1409_s11 = sshll.u32 %s2358_s19, 3  ;;  %v2127_v51 = vsub.f32 %v694_v44, %v734_v46  ;;  %v740_v53 = vand.u32 4294901760, %v696_v49  ;;  %v743_v54 = vand.u32 4294901760, %v697_v50  ;;  %v746_v58 = vand.u32 4294901760, %v698_v56 }
   0xf   : > { %s215_s16 = scalar_lea.vmem %s2351_s0, %s1409_s11  ;;  %v318_v37 = vand.u32 4294901760, %v317_v34  ;;  %v2119_v48 = vpack.c.bf16 %v737_v47, %v734_v46  ;;  %v2129_v52 = vsub.f32 %v695_v45, %v737_v47  ;;  %v749_v59 = vand.u32 4294901760, %v699_v57  ;;  %s219_s17 = scalar_lea.vmem %s2356_s5, %s1409_s11 }
  0x10   : > { %v220_v22 = vld [vmem:[%s215_s16] sm:$0xff]  ;;  %v2135_v55 = vpack.c.bf16 %v743_v54, %v740_v53  ;;  %v752_v63 = vand.u32 4294901760, %v700_v61  ;;  %v755_v0 = vand.u32 4294901760, %v701_v62  ;;  %v2161_v3 = vsub.f32 %v696_v49, %v740_v53 }
  0x11   : > { %v231_v26 = vsel %vm229_vm2, %v220_v22, 0  ;;  %v2147_v60 = vpack.c.bf16 %v749_v59, %v746_v58  ;;  %v2163_v4 = vsub.f32 %v697_v50, %v743_v54  ;;  %v2165_v5 = vsub.f32 %v698_v56, %v746_v58 }
  0x12   : > { %v303_v30 = vand.u32 4294901760, %v231_v26  ;;  %v2159_v2 = vpack.c.bf16 %v755_v0, %v752_v63  ;;  %v2170_v7 = vsub.f32 %v700_v61, %v752_v63  ;;  %v2172_v8 = vsub.f32 %v701_v62, %v755_v0 }
  0x13   : > { %v803_v9 = vand.u32 4294901760, %v2040_v15  ;;  %v810_v10 = vand.u32 4294901760, %v2054_v19  ;;  %v817_v17 = vand.u32 4294901760, %v2057_v20  ;;  %v824_v18 = vand.u32 4294901760, %v2059_v23 }
  0x14   : > { %v304_v33 = vsub.f32 %v231_v26, %v303_v30  ;;  %v845_v45 = vand.u32 4294901760, %v2069_v31  ;;  %v852_v46 = vand.u32 4294901760, %v2071_v32  ;;  %v866_v58 = vand.u32 4294901760, %v2129_v52 }
  0x15   : > { %v2179_v11 = vpack.c.bf16 %v810_v10, %v803_v9  ;;  %v804_v12 = vsub.f32 %v2040_v15, %v803_v9  ;;  %v811_v13 = vsub.f32 %v2054_v19, %v810_v10  ;;  %v2187_v22 = vpack.c.bf16 %v824_v18, %v817_v17 }
  0x16   : > { %v305_v35 = vand.u32 4294901760, %v304_v33  ;;  %v818_v25 = vsub.f32 %v2057_v20, %v817_v17  ;;  %v825_v26 = vsub.f32 %v2059_v23, %v824_v18  ;;  %v2203_v49 = vpack.c.bf16 %v852_v46, %v845_v45 }
  0x17   : > { %v812_v16 = vand.u32 4294901760, %v811_v13  ;;  %v846_v50 = vsub.f32 %v2069_v31, %v845_v45  ;;  %v853_v53 = vsub.f32 %v2071_v32, %v852_v46  ;;  %v867_v63 = vsub.f32 %v2129_v52, %v866_v58 }
  0x18   : > { %1547 = vmatmul.mubr.f32.vlgmr.msra.gmra.mrb[0].mxu0 %v305_v35  ;;  %v306_v36 = vsub.f32 %v304_v33, %v305_v35  ;;  %v826_v29 = vand.u32 4294901760, %v825_v26  ;;  %v873_v10 = vand.u32 4294901760, %v2161_v3  ;;  %v887_v26 = vand.u32 4294901760, %v2165_v5 }
  0x19   : > { %1550 = vmatpush3.msra.mxu0 %v316_v27  ;;  %1551 = vmatprep.mubr.msk.f32.mxu0 %vm1953_vm1, %v1952_v1  ;;  %v819_v27 = vand.u32 4294901760, %v818_v25  ;;  %v847_v54 = vand.u32 4294901760, %v846_v50  ;;  %v854_v56 = vand.u32 4294901760, %v853_v53  ;;  %v868_v9 = vand.u32 4294901760, %v867_v63 }
  0x1a   : > { %v307_v38 = vand.u32 4294901760, %v306_v36  ;;  %1554 = vmatprep.subr.mxu0 %v1952_v1  ;;  %v908_v45 = vand.u32 4294901760, %v2172_v8  ;;  %v1821_v63 = vpack.c.bf16 %v2059_v23, %v2057_v20  ;;  %v1412_v23 = vld [vmem:[%s2355_s4] ss:$0 sm:$0xff] }
  0x1b   : > { %v2193_v34 = vpack.c.bf16 %v826_v29, %v819_v27 }
  0x1c   : > { %1532 = vmatmul.mubr.f32.vlgmr.msra.gmra.mrb[0].mxu1 %v307_v38 }
  0x1d   : > { %1535 = vmatpush3.msra.mxu1 %v318_v37  ;;  %1536 = vmatprep.mubr.msk.f32.mxu1 %vm1953_vm1, %v1952_v1 }
  0x1e   : > { %1539 = vmatprep.subr.mxu1 %v1952_v1 }
  0x20   : > { %1552 = vmatmul.mubr.f32.vlgmr.msra.gmra.mrb[0].mxu0 %v303_v30 }
  0x21   : > { %1555 = vmatpush3.msra.mxu0 %v238_v6  ;;  %1556 = vmatprep.mubr.msk.f32.mxu0 %vm1953_vm1, %v1952_v1  ;;  %v2167_v6 = vsub.f32 %v699_v57, %v749_v59  ;;  %v859_v57 = vand.u32 4294901760, %v2127_v51  ;;  %v2209_v59 = vpack.c.bf16 %v854_v56, %v847_v54  ;;  %v909_v54 = vsub.f32 %v2172_v8, %v908_v45 }
  0x22   : > { %1769 = vmatprep.subr.bf16.mxu0 %v1954_v39 }
  0x23   : > { %v2211_v61 = vpack.c.bf16 %v866_v58, %v859_v57  ;;  %v860_v62 = vsub.f32 %v2127_v51, %v859_v57  ;;  %v894_v27 = vand.u32 4294901760, %v2167_v6  ;;  %v910_v57 = vand.u32 4294901760, %v909_v54 }
  0x24   : > { %1537 = vmatmul.mubr.f32.vlgmr.msra.gmra.mrb[0].mxu1 %v303_v30 }
  0x25   : > { %1540 = vmatpush3.msra.mxu1 %v315_v14  ;;  %1541 = vmatprep.mubr.msk.f32.mxu1 %vm1953_vm1, %v1952_v1  ;;  %v805_v14 = vand.u32 4294901760, %v804_v12  ;;  %v861_v0 = vand.u32 4294901760, %v860_v62  ;;  %v880_v12 = vand.u32 4294901760, %v2163_v4  ;;  %v1818_v62 = vpack.c.bf16 %v2054_v19, %v2040_v15 }
  0x26   : > { %1841 = vmatprep.subr.bf16.mxu1 %v1954_v39  ;;  %v1839_v15 = vpack.c.bf16 %v2172_v8, %v2170_v7 }
  0x27   : > { %v2185_v21 = vpack.c.bf16 %v812_v16, %v805_v14  ;;  %v2217_v13 = vpack.c.bf16 %v868_v9, %v861_v0  ;;  %v2219_v14 = vpack.c.bf16 %v880_v12, %v873_v10  ;;  %v874_v16 = vsub.f32 %v2161_v3, %v873_v10 }
  0x28   : > { %1557 = vmatmul.mubr.f32.vlgmr.msra.gmra.mrb[0].mxu0 %v303_v30  ;;  %v831_v30 = vand.u32 4294901760, %v2062_v24  ;;  %v881_v17 = vsub.f32 %v2163_v4, %v880_v12  ;;  %v1824_v0 = vpack.c.bf16 %v2066_v28, %v2062_v24  ;;  %v1827_v9 = vpack.c.bf16 %v2071_v32, %v2069_v31 }
  0x29   : > { %1771 = vmatpush3.bf16.msra.mxu0 %v2085_v40  ;;  %1591 = vmatprep.mubr.msk.f32.mxu0 %vm1953_vm1, %v1952_v1  ;;  %v875_v18 = vand.u32 4294901760, %v874_v16  ;;  %v1830_v10 = vpack.c.bf16 %v2129_v52, %v2127_v51  ;;  %v1833_v12 = vpack.c.bf16 %v2163_v4, %v2161_v3  ;;  %v1836_v16 = vpack.c.bf16 %v2167_v6, %v2165_v5 }
  0x2a   : > { %1772 = vmatprep.subr.bf16.mxu0 %v1954_v39  ;;  %v832_v36 = vsub.f32 %v2062_v24, %v831_v30  ;;  %v882_v25 = vand.u32 4294901760, %v881_v17 }
  0x2c   : > { %1542 = vmatmul.mubr.f32.vlgmr.msra.gmra.mrb[0].mxu1 %v304_v33  ;;  %v838_v33 = vand.u32 4294901760, %v2066_v28  ;;  %v833_v38 = vand.u32 4294901760, %v832_v36  ;;  %v1809_v29 = vpack.c.bf16 %v882_v25, %v875_v18  ;;  %v895_v36 = vsub.f32 %v2167_v6, %v894_v27  ;;  %v1411_v18 = vld [vmem:[%s2353_s2] ss:$0 sm:$0xff] }
  0x2d   : > { %1843 = vmatpush3.bf16.msra.mxu1 %v2085_v40  ;;  %1774 = vmatpush3.bf16.msra.mxu0 %v2091_v41 }
  0x2e   : > { %1844 = vmatprep.subr.bf16.mxu1 %v1954_v39  ;;  %1775 = vmatprep.subr.bf16.mxu0 %v1954_v39  ;;  %v2195_v35 = vpack.c.bf16 %v838_v33, %v831_v30  ;;  %v839_v37 = vsub.f32 %v2066_v28, %v838_v33  ;;  %v1884_v30 = vpack.c.bf16 %v894_v27, %v887_v26 }
  0x2f   : > { %1696 = vmatprep.mubr.msk.f32.mxu1 %vm1953_vm1, %v1952_v1  ;;  %v888_v33 = vsub.f32 %v2165_v5, %v887_v26 }
  0x30   : > { %v840_v44 = vand.u32 4294901760, %v839_v37 }
  0x31   : > { %1846 = vmatpush3.bf16.msra.mxu1 %v2091_v41  ;;  %1777 = vmatpush3.bf16.msra.mxu0 %v2097_v42  ;;  %v889_v37 = vand.u32 4294901760, %v888_v33 }
  0x32   : > { %1847 = vmatprep.subr.bf16.mxu1 %v1954_v39  ;;  %1778 = vmatprep.subr.bf16.mxu0 %v1954_v39  ;;  %v2201_v47 = vpack.c.bf16 %v840_v44, %v833_v38  ;;  %v896_v38 = vand.u32 4294901760, %v895_v36  ;;  %v901_v44 = vand.u32 4294901760, %v2170_v7 }
  0x34   : > { %v1812_v46 = vpack.c.bf16 %v896_v38, %v889_v37  ;;  %v1887_v50 = vpack.c.bf16 %v908_v45, %v901_v44  ;;  %v902_v53 = vsub.f32 %v2170_v7, %v901_v44 }
  0x35   : > { %1849 = vmatpush3.bf16.msra.mxu1 %v2097_v42  ;;  %1780 = vmatpush3.bf16.msra.mxu0 %v2105_v43 }
  0x36   : > { %1850 = vmatprep.subr.bf16.mxu1 %v1954_v39  ;;  %1781 = vmatprep.subr.bf16.mxu0 %v1954_v39  ;;  %v903_v56 = vand.u32 4294901760, %v902_v53 }
  0x38   : > { %v1815_v58 = vpack.c.bf16 %v910_v57, %v903_v56 }
  0x39   : > { %1852 = vmatpush3.bf16.msra.mxu1 %v2105_v43  ;;  %1783 = vmatpush3.bf16.msra.mxu0 %v2119_v48 }
  0x3a   : > { %1853 = vmatprep.subr.bf16.mxu1 %v1954_v39  ;;  %1784 = vmatprep.subr.bf16.mxu0 %v1954_v39 }
  0x3d   : > { %1855 = vmatpush3.bf16.msra.mxu1 %v2119_v48  ;;  %1786 = vmatpush3.bf16.msra.mxu0 %v2135_v55 }
  0x3e   : > { %1856 = vmatprep.subr.bf16.mxu1 %v1954_v39  ;;  %1787 = vmatprep.subr.bf16.mxu0 %v1954_v39 }
  0x41   : > { %1858 = vmatpush3.bf16.msra.mxu1 %v2135_v55  ;;  %1789 = vmatpush3.bf16.msra.mxu0 %v2147_v60 }
  0x42   : > { %1859 = vmatprep.subr.bf16.mxu1 %v1954_v39  ;;  %1790 = vmatprep.subr.bf16.mxu0 %v1954_v39 }
  0x45   : > { %1861 = vmatpush3.bf16.msra.mxu1 %v2147_v60  ;;  %1792 = vmatpush3.bf16.msra.mxu0 %v2159_v2 }
  0x46   : > { %1862 = vmatprep.subr.bf16.mxu1 %v1954_v39  ;;  %1793 = vmatprep.subr.bf16.mxu0 %v1954_v39 }
  0x49   : > { %1864 = vmatpush3.bf16.msra.mxu1 %v2159_v2 }
  0x4a   : > { %1865 = vmatprep.subr.bf16.mxu1 %v1954_v39 }
  0xfb   : > { %v679_v19 = vpop.f32.mrb[0].mxu0 }
  0xfc   : > { %v1558_v17 = vpop.f32.mrb[1].mxu0 }
  0xff   : > { %v459_v25 = vpop.f32.mrb[0].mxu1 }
 0x100   : > { %v1913_v26 = vadd.f32 %v1411_v18, %v459_v25  ;;  %v1543_v27 = vpop.f32.mrb[1].mxu1 }
 0x102   : > { %v1914_v33 = vadd.f32 %v1913_v26, %v679_v19 }
 0x104   : > { %v683_v36 = vmax.f32 %v1914_v33, 0.0 }
 0x106   : > { %v2250_v37 = vand.u32 4294901760, %v683_v36 }
 0x108   : > { %v2253_v38 = vsub.f32 %v683_v36, %v2250_v37 }
 0x10a   : > { %v792_v44 = vand.u32 4294901760, %v2253_v38 }
 0x10c   : > { %1697 = vmatmul.mubr.f32.vlgmr.msra.gmra.mrb[2].mxu1 %v792_v44  ;;  %v793_v45 = vsub.f32 %v2253_v38, %v792_v44 }
 0x10d   : > { %1867 = vmatpush3.bf16.msra.mxu1 %v2179_v11  ;;  %1731 = vmatprep.mubr.msk.f32.mxu1 %vm1953_vm1, %v1952_v1 }
 0x10e   : > { %1868 = vmatprep.subr.bf16.mxu1 %v1954_v39  ;;  %v794_v53 = vand.u32 4294901760, %v793_v45 }
 0x110   : > { %1592 = vmatmul.mubr.f32.vlgmr.msra.gmra.mrb[2].mxu0 %v794_v53 }
 0x111   : > { %1795 = vmatpush3.bf16.msra.mxu0 %v2185_v21  ;;  %1870 = vmatpush3.bf16.msra.mxu1 %v2187_v22 }
 0x112   : > { %1796 = vmatprep.subr.bf16.mxu0 %v1954_v39  ;;  %1871 = vmatprep.subr.bf16.mxu1 %v1954_v39 }
 0x113   : > { %1626 = vmatprep.mubr.msk.f32.mxu0 %vm1953_vm1, %v1952_v1 }
 0x115   : > { %1798 = vmatpush3.bf16.msra.mxu0 %v2193_v34  ;;  %1873 = vmatpush3.bf16.msra.mxu1 %v2195_v35 }
 0x116   : > { %1799 = vmatprep.subr.bf16.mxu0 %v1954_v39  ;;  %1874 = vmatprep.subr.bf16.mxu1 %v1954_v39 }
 0x119   : > { %1801 = vmatpush3.bf16.msra.mxu0 %v2201_v47  ;;  %1876 = vmatpush3.bf16.msra.mxu1 %v2203_v49 }
 0x11a   : > { %1802 = vmatprep.subr.bf16.mxu0 %v1954_v39  ;;  %1877 = vmatprep.subr.bf16.mxu1 %v1954_v39 }
 0x11d   : > { %1804 = vmatpush3.bf16.msra.mxu0 %v2209_v59  ;;  %1879 = vmatpush3.bf16.msra.mxu1 %v2211_v61 }
 0x11e   : > { %1805 = vmatprep.subr.bf16.mxu0 %v1954_v39  ;;  %1880 = vmatprep.subr.bf16.mxu1 %v1954_v39 }
 0x121   : > { %1807 = vmatpush3.bf16.msra.mxu0 %v2217_v13  ;;  %1882 = vmatpush3.bf16.msra.mxu1 %v2219_v14 }
 0x122   : > { %1808 = vmatprep.subr.bf16.mxu0 %v1954_v39  ;;  %1883 = vmatprep.subr.bf16.mxu1 %v1954_v39 }
 0x125   : > { %1810 = vmatpush3.bf16.msra.mxu0 %v1809_v29  ;;  %1885 = vmatpush3.bf16.msra.mxu1 %v1884_v30 }
 0x126   : > { %1811 = vmatprep.subr.bf16.mxu0 %v1954_v39  ;;  %1886 = vmatprep.subr.bf16.mxu1 %v1954_v39 }
 0x129   : > { %1813 = vmatpush3.bf16.msra.mxu0 %v1812_v46  ;;  %1888 = vmatpush3.bf16.msra.mxu1 %v1887_v50 }
 0x12a   : > { %1814 = vmatprep.subr.bf16.mxu0 %v1954_v39  ;;  %1889 = vmatprep.subr.bf16.mxu1 %v1954_v39 }
 0x12c   : > { %1732 = vmatmul.mubr.f32.vlgmr.msra.gmra.mrb[2].mxu1 %v2250_v37 }
 0x12d   : > { %1816 = vmatpush3.bf16.msra.mxu0 %v1815_v58  ;;  %1891 = vmatpush3.bf16.msra.mxu1 %v2085_v40 }
 0x12e   : > { %1817 = vmatprep.subr.bf16.mxu0 %v1954_v39  ;;  %1892 = vmatprep.subr.bf16.mxu1 %v1954_v39 }
 0x12f   : > { %1766 = vmatprep.mubr.msk.f32.mxu1 %vm1953_vm1, %v1952_v1 }
 0x130   : > { %1627 = vmatmul.mubr.f32.vlgmr.msra.gmra.mrb[2].mxu0 %v2250_v37 }
 0x131   : > { %1819 = vmatpush3.bf16.msra.mxu0 %v1818_v62  ;;  %1894 = vmatpush3.bf16.msra.mxu1 %v2091_v41 }
 0x132   : > { %1820 = vmatprep.subr.bf16.mxu0 %v1954_v39  ;;  %1895 = vmatprep.subr.bf16.mxu1 %v1954_v39 }
 0x133   : > { %1661 = vmatprep.mubr.msk.f32.mxu0 %vm1953_vm1, %v1952_v1 }
 0x135   : > { %1822 = vmatpush3.bf16.msra.mxu0 %v1821_v63  ;;  %1897 = vmatpush3.bf16.msra.mxu1 %v2097_v42 }
 0x136   : > { %1823 = vmatprep.subr.bf16.mxu0 %v1954_v39  ;;  %1898 = vmatprep.subr.bf16.mxu1 %v1954_v39 }
 0x139   : > { %1825 = vmatpush3.bf16.msra.mxu0 %v1824_v0  ;;  %1900 = vmatpush3.bf16.msra.mxu1 %v2105_v43 }
 0x13a   : > { %1826 = vmatprep.subr.bf16.mxu0 %v1954_v39  ;;  %1901 = vmatprep.subr.bf16.mxu1 %v1954_v39 }
 0x13d   : > { %1828 = vmatpush3.bf16.msra.mxu0 %v1827_v9  ;;  %1903 = vmatpush3.bf16.msra.mxu1 %v2119_v48 }
 0x13e   : > { %1829 = vmatprep.subr.bf16.mxu0 %v1954_v39  ;;  %1904 = vmatprep.subr.bf16.mxu1 %v1954_v39 }
 0x141   : > { %1831 = vmatpush3.bf16.msra.mxu0 %v1830_v10  ;;  %1906 = vmatpush3.bf16.msra.mxu1 %v2135_v55 }
 0x142   : > { %1832 = vmatprep.subr.bf16.mxu0 %v1954_v39  ;;  %1907 = vmatprep.subr.bf16.mxu1 %v1954_v39 }
 0x145   : > { %1834 = vmatpush3.bf16.msra.mxu0 %v1833_v12  ;;  %1909 = vmatpush3.bf16.msra.mxu1 %v2147_v60 }
 0x146   : > { %1835 = vmatprep.subr.bf16.mxu0 %v1954_v39  ;;  %1910 = vmatprep.subr.bf16.mxu1 %v1954_v39 }
 0x149   : > { %1837 = vmatpush3.bf16.msra.mxu0 %v1836_v16  ;;  %1912 = vmatpush3.bf16.msra.mxu1 %v2159_v2 }
 0x14a   : > { %1838 = vmatprep.subr.bf16.mxu0 %v1954_v39 }
 0x14c   : > { %1767 = vmatmul.mubr.f32.vlgmr.msra.gmra.mrb[2].mxu1 %v2250_v37 }
 0x14d   : > { %1840 = vmatpush3.bf16.msra.mxu0 %v1839_v15 }
 0x150   : > { %1662 = vmatmul.mubr.f32.vlgmr.msra.gmra.mrb[2].mxu0 %v2253_v38 }
 0x21f   : > { %v1346_v1 = vpop.f32.mrb[2].mxu1 }
 0x220   : > { %v1768_v20 = vpop.f32.mrb[3].mxu1 }
 0x223   : > { %v1051_v24 = vpop.f32.mrb[2].mxu0 }
 0x224   : > { %v1915_v28 = vadd.f32 %v1412_v23, %v1051_v24  ;;  %v1663_v31 = vpop.f32.mrb[3].mxu0 }
 0x226   : > { %v1916_v32 = vadd.f32 %v1915_v28, %v1346_v1 }
 0x228   : > { %1350 = vst.msk [vmem:[%s219_s17] sm:$0xff] %vm229_vm2, %v1916_v32 }
 0x229 PF: > { %s15_s18 = sadd.s32 1, %s1950_s18  }
 0x22a   : > { %p12_p4 = scmp.ge.s32.totalorder %s15_s18, 4  }
 0x22c   :  { %14 = sbr.rel (!%p12_p4) target bundleno = 1 (0x1), region = 70 }

</bundles_post_ra>
